<compile_context>
chip_gen: v5e
topology: v5e:2x2
jax: 0.10.0
libtpu: 0.0.40
codegen_flags: <defaults>
</compile_context>

<pallas_src>
import functools

import jax
import jax.numpy as jnp
from jax import lax
from jax.experimental import pallas as pl
from jax.experimental.pallas import tpu as pltpu

_DEF_BLOCK_BYTES = 4 * 1024 * 1024     # per-block cap; safe on v7x (64 MiB VMEM)
_VMEM_LIMIT = 32 * 1024 * 1024         # scoped VMEM request (fits all gens)


def _pick_lane_tile(n_lanes, row_bytes, max_block_bytes):
    """Largest lane tile (multiple of 128, dividing n_lanes) within the byte cap.

    n_lanes must be a multiple of 128. Returns at least 128.
    """
    groups = n_lanes // 128
    best = 1
    for d in range(1, groups + 1):
        if groups % d == 0 and d * 128 * row_bytes <= max_block_bytes:
            best = d
    return best * 128


# --------------------------------------------------------------------------
# Kernel 1: pooled mean (tiled, lane-wide accumulator) + excitation + sigmoid
# --------------------------------------------------------------------------
def _se_gate_kernel(x_ref, w1_ref, w2_ref, gate_ref, acc_ref, *, inv_hw):
    """Grid (b, n_hw_tiles); hw is the trailing 'arbitrary' reduction axis.

    x_ref:    (1, c_eff, TILE)   input tile, native dtype
    w1_ref:   (c//r, c_eff)      Linear-1 weight (columns pre-repeated if folded)
    w2_ref:   (c, c//r)          Linear-2 weight
    gate_ref: (1, c, 1)          f32 sigmoid gate (resident across t)
    acc_ref:  (c_eff, 128)       f32 lane-wide partial-sum accumulator (VMEM)
    """
    t = pl.program_id(1)

    @pl.when(t == 0)
    def _init():
        acc_ref[...] = jnp.zeros_like(acc_ref)

    # Steady state: pure VPU adds over lane-aligned 128-wide chunks.  No
    # cross-lane reduce per tile, bounded live vregs even for multi-MiB tiles.
    n_chunks = x_ref.shape[-1] // 128

    def _chunk(j, acc):
        start = pl.multiple_of(j * 128, 128)
        return acc + x_ref[0, :, pl.ds(start, 128)].astype(jnp.float32)

    acc_ref[...] = lax.fori_loop(0, n_chunks, _chunk, acc_ref[...],
                                 unroll=min(8, n_chunks))

    @pl.when(t == pl.num_programs(1) - 1)
    def _finalize():
        # Single cross-lane (XLU) reduce, then the tiny excitation matmuls
        # with the channel axis kept on sublanes (no transposes).
        pooled = jnp.sum(acc_ref[...], axis=-1, keepdims=True)      # (c_eff, 1)
        y = pooled * inv_hw
        h1 = jnp.dot(w1_ref[...].astype(jnp.float32), y,
                     preferred_element_type=jnp.float32)            # (c//r, 1)
        h1 = jnp.maximum(h1, 0.0)
        y2 = jnp.dot(w2_ref[...].astype(jnp.float32), h1,
                     preferred_element_type=jnp.float32)            # (c, 1)
        gate_ref[...] = jax.nn.sigmoid(y2)[None].astype(gate_ref.dtype)


# --------------------------------------------------------------------------
# Kernel 2: fused broadcast + Fuse combine  (out = x0 * gate + x0)
# --------------------------------------------------------------------------
def _fuse_combine_kernel(x_ref, gate_ref, o_ref):
    """Grid (b//b_blk, n_hw_tiles), all 'parallel'.

    x_ref:    (b_blk, c, TILE)  x0 tile, native dtype
    gate_ref: (b_blk, c, 1)     f32 gate
    o_ref:    (b_blk, c, TILE)  output tile (x0*g + x0), native dtype
    """
    x = x_ref[...].astype(jnp.float32)
    g = gate_ref[...]
    o_ref[...] = (x * g + x).astype(o_ref.dtype)


# --------------------------------------------------------------------------
# Wrappers
# --------------------------------------------------------------------------
def senet_gate(x, w1, w2, *, max_block_bytes=_DEF_BLOCK_BYTES):
    """SE gate. x: (b, c, h, w); w1: (c//r, c); w2: (c, c//r) -> (b, c, 1, 1) f32."""
    b, c, h, w = x.shape
    hw = h * w
    itemsize = jnp.dtype(x.dtype).itemsize

    # Fold spatial into sublanes when channels underfill the sublane axis
    # (8 for f32, 16 for bf16, 32 for int8).
    sublanes = 32 // itemsize
    fold = max(1, sublanes // c) if c < sublanes else 1

    hw_rows = -(-hw // fold)                  # per-fold row length (ceil)
    hw_rows_p = -(-hw_rows // 128) * 128      # pad rows to a multiple of 128
    hw_p = hw_rows_p * fold
    c_eff = c * fold

    x_flat = x.reshape(b, c, hw)
    if hw_p != hw:
        # Zero padding: sums unaffected; inv_hw stays 1/true_hw.
        x_flat = jnp.pad(x_flat, ((0, 0), (0, 0), (0, hw_p - hw)))
    if fold > 1:
        x_flat = x_flat.reshape(b, c_eff, hw_rows_p)
        # Absorb the per-channel fold-sum into W1: W1f[:, i*fold+s] = W1[:, i].
        w1_eff = jnp.repeat(w1, fold, axis=1)
    else:
        w1_eff = w1

    tile = _pick_lane_tile(hw_rows_p, c_eff * itemsize, max_block_bytes)
    n_t = hw_rows_p // tile
    inv_hw = 1.0 / float(hw)

    gate = pl.pallas_call(
        functools.partial(_se_gate_kernel, inv_hw=inv_hw),
        out_shape=jax.ShapeDtypeStruct((b, c, 1), jnp.float32),
        grid=(b, n_t),
        in_specs=[
            pl.BlockSpec((1, c_eff, tile), lambda i, t: (i, 0, t)),
            pl.BlockSpec(w1_eff.shape, lambda i, t: (0, 0)),
            pl.BlockSpec(w2.shape, lambda i, t: (0, 0)),
        ],
        out_specs=pl.BlockSpec((1, c, 1), lambda i, t: (i, 0, 0)),
        scratch_shapes=[pltpu.VMEM((c_eff, 128), jnp.float32)],
        compiler_params=pltpu.CompilerParams(
            # hw axis MUST stay "arbitrary": resident accumulator + gate output.
            dimension_semantics=("parallel", "arbitrary"),
            vmem_limit_bytes=_VMEM_LIMIT),
    )(x_flat, w1_eff, w2)
    return gate.reshape(b, c, 1, 1)


def fuse_se_forward(x0, x_fuse, w1, w2, *, max_block_bytes=_DEF_BLOCK_BYTES):
    """Fuse's SE path: gate = SENet(x_fuse); return x0 * gate + x0 (fused)."""
    gate = senet_gate(x_fuse, w1, w2, max_block_bytes=max_block_bytes)
    b, c, h, w = x0.shape
    hw = h * w
    itemsize = jnp.dtype(x0.dtype).itemsize
    x0_flat = x0.reshape(b, c, hw)
    gate_flat = gate.reshape(b, c, 1)

    if hw % 128 != 0:
        # TODO(synk): odd spatial sizes use the XLA fused elementwise for the
        # combine; the Pallas gate kernel above still handles them via padding.
        xf = x0_flat.astype(jnp.float32)
        return (xf * gate_flat + xf).astype(x0.dtype).reshape(b, c, h, w)

    tile = _pick_lane_tile(hw, c * itemsize, max_block_bytes)
    n_t = hw // tile
    # Fold small batches into one block to cut grid steps (pure-bandwidth op).
    b_blk = 1
    for d in range(b, 0, -1):
        if b % d == 0 and d * c * tile * itemsize <= max_block_bytes:
            b_blk = d
            break

    out = pl.pallas_call(
        _fuse_combine_kernel,
        out_shape=jax.ShapeDtypeStruct((b, c, hw), x0.dtype),
        grid=(b // b_blk, n_t),
        in_specs=[
            pl.BlockSpec((b_blk, c, tile), lambda i, t: (i, 0, t)),
            pl.BlockSpec((b_blk, c, 1), lambda i, t: (i, 0, 0)),
        ],
        out_specs=pl.BlockSpec((b_blk, c, tile), lambda i, t: (i, 0, t)),
        compiler_params=pltpu.CompilerParams(
            dimension_semantics=("parallel", "parallel"),
            vmem_limit_bytes=_VMEM_LIMIT),
    )(x0_flat, gate_flat)
    return out.reshape(b, c, h, w)


def senet_forward(x, w1, w2, **kw):
    """Original SENet.forward semantics (expanded gate map).

    The expansion is left as a lazy XLA broadcast so it fuses into whatever
    consumes it (Fuse's x*g + x) instead of costing a full HBM round-trip.
    """
    gate = senet_gate(x, w1, w2, **kw)
    return jnp.broadcast_to(gate, x.shape).astype(x.dtype)


# --------------------------------------------------------------------------
# Pure-JAX references
# --------------------------------------------------------------------------
def senet_gate_reference(x, w1, w2):
    y = jnp.mean(x.astype(jnp.float32), axis=(2, 3))                # (b, c)
    y = jnp.maximum(y @ w1.T, 0.0)
    y = jax.nn.sigmoid(y @ w2.T)
    return y[:, :, None, None]


# --------------------------------------------------------------------------
if __name__ == "__main__":
    base_key = jax.random.PRNGKey(0)

    def check(cfg_key, b, c, h, w, ratio, **kw):
        kx, kf, k1, k2 = jax.random.split(cfg_key, 4)
        x0 = jax.random.normal(kx, (b, c, h, w), dtype=jnp.float32)
        x_fuse = x0 + jax.random.normal(kf, (b, c, h, w), dtype=jnp.float32)
        # PyTorch nn.Linear weights: (out_features, in_features), bias=False.
        w1 = jax.random.normal(k1, (c // ratio, c), dtype=jnp.float32) * 0.5
        w2 = jax.random.normal(k2, (c, c // ratio), dtype=jnp.float32) * 0.5

        gate_ref = senet_gate_reference(x_fuse, w1, w2)

        gate = jax.block_until_ready(senet_gate(x_fuse, w1, w2, **kw))
        assert gate.shape == (b, c, 1, 1)
        assert jnp.allclose(gate, gate_ref, atol=2e-5, rtol=2e-5), "gate mismatch"

        se_out = jax.block_until_ready(senet_forward(x_fuse, w1, w2, **kw))
        se_ref = jnp.broadcast_to(gate_ref, x_fuse.shape).astype(x_fuse.dtype)
        assert se_out.shape == (b, c, h, w)
        assert jnp.allclose(se_out, se_ref, atol=2e-5, rtol=2e-5), "SENet mismatch"

        fused = jax.block_until_ready(fuse_se_forward(x0, x_fuse, w1, w2, **kw))
        fused_ref = (x0 * gate_ref + x0).astype(x0.dtype)
        assert fused.shape == (b, c, h, w)
        assert jnp.allclose(fused, fused_ref, atol=2e-5, rtol=2e-5), "fuse mismatch"

    keys = jax.random.split(base_key, 4)
    # c=4 exercises the sublane-fold path (fold=2); single reduction step.
    check(keys[0], 2, 4, 32, 32, 2)
    # SENet(64) exactly as instantiated inside CLFF2's Fuse (hw=256, one tile).
    check(keys[1], 2, 64, 16, 16, 2)
    # Small block budget forces the multi-step (t > 0) accumulation path.
    check(keys[2], 1, 64, 32, 32, 2, max_block_bytes=128 * 1024)
    # Non-multiple-of-128 spatial size: gate kernel pads; combine falls back to XLA.
    check(keys[3], 2, 4, 10, 10, 2)

    print("KERNEL_OK")
</pallas_src>

<mosaic_0001>
module attributes {stable_mosaic.version = 11 : i64} {
  func.func @_se_gate_kernel(%arg0: i32, %arg1: i32, %arg2: memref<1x8x512xf32, #tpu.memory_space<vmem>>, %arg3: memref<2x8xf32, #tpu.memory_space<vmem>>, %arg4: memref<4x2xf32, #tpu.memory_space<vmem>>, %arg5: memref<1x4x1xf32, #tpu.memory_space<vmem>>, %arg6: memref<8x128xf32, #tpu.memory_space<vmem>>) attributes {dimension_semantics = [#tpu.dimension_semantics<parallel>, #tpu.dimension_semantics<arbitrary>], iteration_bounds = array<i64: 2, 1>, scalar_prefetch = 0 : i64, scratch_operands = 1 : i64, tpu.core_type = #tpu.core_type<tc>, window_params = [{transform_indices = @transform_0, window_bounds = array<i64: 1, 8, 512>}, {pipeline_mode = #tpu.pipeline_mode<synchronous>, transform_indices = @transform_1, window_bounds = array<i64: 2, 8>}, {pipeline_mode = #tpu.pipeline_mode<synchronous>, transform_indices = @transform_2, window_bounds = array<i64: 4, 2>}, {transform_indices = @transform_3, window_bounds = array<i64: 1, 4, 1>}]} {
    %c0_i32 = arith.constant 0 : i32
    %0 = arith.cmpi eq, %arg1, %c0_i32 : i32
    %1 = arith.extui %0 : i1 to i32
    %c0_i32_0 = arith.constant 0 : i32
    %2 = arith.cmpi ne, %1, %c0_i32_0 : i32
    scf.if %2 {
      %cst = arith.constant 0.000000e+00 : f32
      %32 = vector.broadcast %cst : f32 to vector<8x128xf32>
      %c0_18 = arith.constant 0 : index
      %c0_19 = arith.constant 0 : index
      %33 = vector.load %arg6[%c0_18, %c0_19] : memref<8x128xf32, #tpu.memory_space<vmem>>, vector<8x128xf32>
      tpu.vector_store %arg6[%c0_18, %c0_19], %32 {strides = array<i32>} : memref<8x128xf32, #tpu.memory_space<vmem>>, vector<8x128xf32>,
    } else {
    }
    %c0 = arith.constant 0 : index
    %c0_1 = arith.constant 0 : index
    %3 = vector.load %arg6[%c0, %c0_1] : memref<8x128xf32, #tpu.memory_space<vmem>>, vector<8x128xf32>
    %c0_i32_2 = arith.constant 0 : i32
    %c128_i32 = arith.constant 128 : i32
    %4 = arith.muli %c0_i32_2, %c128_i32 : i32
    %5 = tpu.assume_multiple %4, 128 : i32
    %c0_3 = arith.constant 0 : index
    %c0_4 = arith.constant 0 : index
    %6 = arith.index_cast %5 : i32 to index
    %7 = vector.load %arg2[%c0_3, %c0_4, %6] : memref<1x8x512xf32, #tpu.memory_space<vmem>>, vector<1x8x128xf32>
    %8 = vector.shape_cast %7 : vector<1x8x128xf32> to vector<8x128xf32>
    %9 = arith.addf %3, %8 : vector<8x128xf32>
    %c1_i32 = arith.constant 1 : i32
    %c128_i32_5 = arith.constant 128 : i32
    %10 = arith.muli %c1_i32, %c128_i32_5 : i32
    %11 = tpu.assume_multiple %10, 128 : i32
    %c0_6 = arith.constant 0 : index
    %c0_7 = arith.constant 0 : index
    %12 = arith.index_cast %11 : i32 to index
    %13 = vector.load %arg2[%c0_6, %c0_7, %12] : memref<1x8x512xf32, #tpu.memory_space<vmem>>, vector<1x8x128xf32>
    %14 = vector.shape_cast %13 : vector<1x8x128xf32> to vector<8x128xf32>
    %15 = arith.addf %9, %14 : vector<8x128xf32>
    %c2_i32 = arith.constant 2 : i32
    %c128_i32_8 = arith.constant 128 : i32
    %16 = arith.muli %c2_i32, %c128_i32_8 : i32
    %17 = tpu.assume_multiple %16, 128 : i32
    %c0_9 = arith.constant 0 : index
    %c0_10 = arith.constant 0 : index
    %18 = arith.index_cast %17 : i32 to index
    %19 = vector.load %arg2[%c0_9, %c0_10, %18] : memref<1x8x512xf32, #tpu.memory_space<vmem>>, vector<1x8x128xf32>
    %20 = vector.shape_cast %19 : vector<1x8x128xf32> to vector<8x128xf32>
    %21 = arith.addf %15, %20 : vector<8x128xf32>
    %c3_i32 = arith.constant 3 : i32
    %c128_i32_11 = arith.constant 128 : i32
    %22 = arith.muli %c3_i32, %c128_i32_11 : i32
    %23 = tpu.assume_multiple %22, 128 : i32
    %c0_12 = arith.constant 0 : index
    %c0_13 = arith.constant 0 : index
    %24 = arith.index_cast %23 : i32 to index
    %25 = vector.load %arg2[%c0_12, %c0_13, %24] : memref<1x8x512xf32, #tpu.memory_space<vmem>>, vector<1x8x128xf32>
    %26 = vector.shape_cast %25 : vector<1x8x128xf32> to vector<8x128xf32>
    %27 = arith.addf %21, %26 : vector<8x128xf32>
    %c4_i32 = arith.constant 4 : i32
    %c0_14 = arith.constant 0 : index
    %c0_15 = arith.constant 0 : index
    %28 = vector.load %arg6[%c0_14, %c0_15] : memref<8x128xf32, #tpu.memory_space<vmem>>, vector<8x128xf32>
    tpu.vector_store %arg6[%c0_14, %c0_15], %27 {strides = array<i32>} : memref<8x128xf32, #tpu.memory_space<vmem>>, vector<8x128xf32>,
    %c0_i32_16 = arith.constant 0 : i32
    %29 = arith.cmpi eq, %arg1, %c0_i32_16 : i32
    %30 = arith.extui %29 : i1 to i32
    %c0_i32_17 = arith.constant 0 : i32
    %31 = arith.cmpi ne, %30, %c0_i32_17 : i32
    scf.if %31 {
      %c0_18 = arith.constant 0 : index
      %c0_19 = arith.constant 0 : index
      %32 = vector.load %arg6[%c0_18, %c0_19] : memref<8x128xf32, #tpu.memory_space<vmem>>, vector<8x128xf32>
      %cst = arith.constant dense<0.000000e+00> : vector<8xf32>
      %33 = vector.multi_reduction <add>, %32, %cst [1] : vector<8x128xf32> to vector<8xf32>
      %34 = vector.shape_cast %33 : vector<8xf32> to vector<8x1xf32>
      %cst_20 = arith.constant 9.765625E-4 : f32
      %35 = vector.broadcast %cst_20 : f32 to vector<8x1xf32>
      %36 = arith.mulf %34, %35 : vector<8x1xf32>
      %c0_21 = arith.constant 0 : index
      %c0_22 = arith.constant 0 : index
      %37 = vector.load %arg3[%c0_21, %c0_22] : memref<2x8xf32, #tpu.memory_space<vmem>>, vector<2x8xf32>
      %cst_23 = arith.constant dense<0.000000e+00> : vector<2x1xf32>
      %38 = tpu.matmul %37, %36, %cst_23 {dimension_numbers = #tpu.dot_dimension_numbers<[1], [0], [0], [1], [0, 0, 1, 1], [], []>} : vector<2x8xf32>, vector<8x1xf32>, vector<2x1xf32> -> vector<2x1xf32>
      %cst_24 = arith.constant 0.000000e+00 : f32
      %39 = vector.broadcast %cst_24 : f32 to vector<2x1xf32>
      %40 = arith.maximumf %38, %39 : vector<2x1xf32>
      %c0_25 = arith.constant 0 : index
      %c0_26 = arith.constant 0 : index
      %41 = vector.load %arg4[%c0_25, %c0_26] : memref<4x2xf32, #tpu.memory_space<vmem>>, vector<4x2xf32>
      %cst_27 = arith.constant dense<0.000000e+00> : vector<4x1xf32>
      %42 = tpu.matmul %41, %40, %cst_27 {dimension_numbers = #tpu.dot_dimension_numbers<[1], [0], [0], [1], [0, 0, 1, 1], [], []>} : vector<4x2xf32>, vector<2x1xf32>, vector<4x1xf32> -> vector<4x1xf32>
      %43 = arith.negf %42 : vector<4x1xf32>
      %44 = math.exp %43 : vector<4x1xf32>
      %cst_28 = arith.constant 1.000000e+00 : f32
      %45 = vector.broadcast %cst_28 : f32 to vector<4x1xf32>
      %46 = arith.addf %45, %44 : vector<4x1xf32>
      %47 = arith.divf %45, %46 : vector<4x1xf32>
      %48 = vector.shape_cast %47 : vector<4x1xf32> to vector<1x4x1xf32>
      %c0_29 = arith.constant 0 : index
      %c0_30 = arith.constant 0 : index
      %c0_31 = arith.constant 0 : index
      %49 = vector.load %arg5[%c0_29, %c0_30, %c0_31] : memref<1x4x1xf32, #tpu.memory_space<vmem>>, vector<1x4x1xf32>
      tpu.vector_store %arg5[%c0_29, %c0_30, %c0_31], %48 {strides = array<i32>} : memref<1x4x1xf32, #tpu.memory_space<vmem>>, vector<1x4x1xf32>,
    } else {
    }
    return
  }
  func.func @transform_0(%arg0: i32, %arg1: i32) -> (i32, i32, i32) {
    %c0_i32 = arith.constant 0 : i32
    %c0_i32_0 = arith.constant 0 : i32
    return %arg0, %c0_i32, %arg1 : i32, i32, i32
  }
  func.func @transform_1(%arg0: i32, %arg1: i32) -> (i32, i32) {
    %c0_i32 = arith.constant 0 : i32
    %c0_i32_0 = arith.constant 0 : i32
    %c0_i32_1 = arith.constant 0 : i32
    return %c0_i32, %c0_i32_0 : i32, i32
  }
  func.func @transform_2(%arg0: i32, %arg1: i32) -> (i32, i32) {
    %c0_i32 = arith.constant 0 : i32
    %c0_i32_0 = arith.constant 0 : i32
    %c0_i32_1 = arith.constant 0 : i32
    return %c0_i32, %c0_i32_0 : i32, i32
  }
  func.func @transform_3(%arg0: i32, %arg1: i32) -> (i32, i32, i32) {
    %c0_i32 = arith.constant 0 : i32
    %c0_i32_0 = arith.constant 0 : i32
    %c0_i32_1 = arith.constant 0 : i32
    return %arg0, %c0_i32, %c0_i32_0 : i32, i32, i32
  }
}

</mosaic_0001>

<bundles_post_ra>
// kernel: tpu_custom_call.1
= control target key start
LH: loop header
LB: loop body
LE: loop exit
PB: predicated region body
PF: predicated region fallthrough
CT: control target
= control target key end

     0   :  { %8 = vsyncpa [#allocation4], 0  ;;  %s658_s0 = inlined_call_operand.hbm [shape: f32[2,8,512], index: 0, kind: input, shape index: {}]   ;;  %s659_s1 = inlined_call_operand.vmem [shape: f32[2,8], index: 1, kind: input, shape index: {}]   ;;  %s660_s2 = inlined_call_operand.vmem [shape: f32[4,2], index: 2, kind: input, shape index: {}]   ;;  %s661_s3 = inlined_call_operand.vmem [shape: f32[2,4,1], index: 3, kind: output, shape index: {}]  }
   0x1   :  { %10 = vsyncpa [#allocation4 + $0x1], 0  ;;  %s564_s12 = smov 0   ;;  %s566_s13 = smov 0  }
   0x2   :  { %s568_s14 = smov 0   ;;  %s570_s15 = smov 0  }
   0x3   :  { %s572_s16 = smov 0   ;;  %s574_s17 = smov 0  }
   0x4 LB: > { %s383_s18 = sadd.s32 4294967295, %s542_s17   ;;  %s28_s19 = sadd.s32 1, %s538_s16  ;;  %s542_s17 = sphi %s574_s17, %s16_s17   ;;  %s538_s16 = sphi %s572_s16, %s668_s16   ;;  %s534_s15 = sphi %s570_s15, %s667_s15   ;;  %s530_s14 = sphi %s568_s14, %s666_s14   ;;  %s526_s13 = sphi %s566_s13, %s665_s13   ;;  %s522_s12 = sphi %s564_s12, %s664_s12  }
   0x5   : > { %p30_p0 = scmp.ge.s32.totalorder %s28_s19, 2  ;;  %s37_s20 = sadd.s32 1, %s530_s14 }
   0x6   : > { %p44_p1 = scmp.ne.s32.totalorder %s530_s14, %s526_s13  ;;  %p45_p2 = scmp.eq.s32.totalorder %s542_s17, 0 }
   0x7   : > { %s670_s19 = smov (%p30_p0, %s28_s19), 0  ;;  %p50_p4 = scmp.ne.s32.totalorder %s526_s13, %s522_s12 }
   0x8   : > { %p600_p3 = por %p45_p2, %p44_p1  ;;  %s32_s22 = ssub.s32 %s538_s16, %s670_s19 }
   0x9   : > { %p51_p5 = scmp.eq.s32.totalorder %s383_s18, 0  ;;  %p35_p6 = scmp.eq.s32.totalorder %s32_s22, 0 }
   0xa   : > { %p409_p8 = scmp.lt.s32.totalorder %s542_s17, 2  ;;  %s148_s25 = sand.u32 1, %s530_s14  }
   0xb   : > { %p607_p7 = por %p51_p5, %p50_p4  ;;  %s402_s26 = sshll.u32 %s538_s16, 5 }
   0xc   : > { %s613_s24 = scalar_select %p35_p6, %s530_s14, %s37_s20  }
   0xd   : > { %s387_s27 = sshll.u32 %s148_s25, 5  ;;  %s159_s30 = scalar_lea.hbm %s658_s0, %s402_s26 }
   0xe   : > { %s161_s4 = sshll.u32 %s159_s30, 4  ;;  %s152_s5 = scalar_lea.vmem [#allocation3], %s387_s27  ;;  %s162_s4 = int_to_ptr.hbm [resolvable:$true] %s161_s4 }
   0xf   : > { %s163_s6 = sshll.u32 %s152_s5, 4  ;;  %p406_p9 = pnand %p409_p8, %p600_p3  ;;  %s164_s6 = int_to_ptr.vmem [resolvable:$true] %s163_s6 }
  0x10   : > { %p390_p10 = scmp.ge.s32.totalorder %s542_s17, 1  ;;  %p168_p11 = scmp.lt.s32.totalorder %s542_s17, 3 }
  0x11   : > { %s149_s7 = scalar_lea.sflag [#allocation4], %s148_s25 }
  0x12   : > { %408 = dma.hbm_to_vmem [thread:$0]  (!%p406_p9), %s162_s4, 512, %s164_s6, %s149_s7  }
  0x13   : > { %p169_p12 = pnand %p390_p10, %p168_p11 }
  0x14   : > { %s174_s8 = sand.u32 (!%p169_p12), 1, %s526_s13  }
  0x15   : > { %172 = sbr.rel (%p169_p12) target bundleno = 437 (0x1b5), region = 32  ;;  %s391_s9 = sshll.u32 (!%p169_p12), %s174_s8, 5 }
  0x16   : > { %s175_s10 = scalar_lea.sflag (!%p169_p12), [#allocation4], %s174_s8  ;;  %s178_s11 = scalar_lea.vmem (!%p169_p12), [#allocation3], %s391_s9 }
  0x1a   : > { %517 = dma.done.wait (%p607_p7), %s175_s10, 512  }
  0x1b   : > { %519 = vsyncadd (%p607_p7), %s175_s10, 4294966784  ;;  %v212_v0 = vld [vmem:[%s178_s11] sm:$0xff]  ;;  %v393_v1 = vld [vmem:[%s178_s11 + $0x8] sm:$0xff]  ;;  %vm232_vm0 = vcmask 64512   ;;  %vm262_vm1 = vcmask 1041408   ;;  %vm258_vm2 = vcmask 15360  }
  0x1c   : > { %v394_v2 = vld [vmem:[%s178_s11 + $0x10] sm:$0xff]  ;;  %v216_v3 = vadd.f32 %v393_v1, %v212_v0  ;;  %v395_v4 = vld [vmem:[%s178_s11 + $0x18] sm:$0xff]  ;;  %v231_v9 = vld [vmem:[%s659_s1] sm:$0x3]  ;;  %p202_p13 = scmp.lt.s32.totalorder %s534_s15, 1  ;;  %vm305_vm6 = vcmask 3072  }
  0x1d   : > { %v257_v12 = vld [vmem:[%s660_s2] sm:$0xf] }
  0x1e   : > { %v219_v5 = vadd.f32 %v394_v2, %v216_v3  ;;  %s672_s15 = smov (!%p202_p13, %s534_s15), 1 }
  0x1f   : > { %s392_s22 = sshll.u32 %s672_s15, 2 }
  0x20   : > { %v222_v6 = vadd.f32 %v395_v4, %v219_v5  ;;  %s205_s26 = scalar_lea.vmem %s661_s3, %s392_s22 }
  0x22   : > { %228 = vadd.xlane.f32.xlu0 %v222_v6 }
  0x95   : > { %v229_v7 = vpop.xlane.xlu0 %228 }
  0x96   : > { %v230_v8 = vmul.f32 0.0009765625, %v229_v7 }
  0x98   : > { %251 = vmatpush.msra.mxu0 %v230_v8 }
  0x99   : > { %396 = vmatmul.msk.f32.vlgmr.msra.gmra.mxu0 %vm232_vm0, %v231_v9 }
 0x116   : > { %v253_v10 = vpop.f32.mrf.mxu0 }
 0x117   : > { %v256_v11 = vmax.f32 %v253_v10, 0.0 }
 0x119   : > { %397 = vmatpush.msk.msra.mxu1 %vm262_vm1, %v256_v11 }
 0x11a   : > { %398 = vmatmul.msk.f32.vlgmr.msra.gmra.mxu1 %vm258_vm2, %v257_v12 }
 0x197   : > { %v283_v13 = vpop.f32.mrf.mxu1 }
 0x198   : > { %v399_v14 = vmul.f32 -1.442695, %v283_v13 }
 0x19a   : > { %458 = vpow2.f32 %v399_v14 }
 0x1a0   : > { %v459_v15 = vpop.eup %458 }
 0x1a1   : > { %v289_v16 = vadd.f32 1.0, %v459_v15 }
 0x1a3   : > { %460 = vrcp.f32 %v289_v16  ;;  %v301_v20 = vand.u32 2147483648, %v289_v16  ;;  %v299_v22 = vand.u32 2147483647, %v289_v16  ;;  %vm295_vm4 = vweird.f32 %v289_v16 }
 0x1a5   : > { %v302_v24 = vor.u32 1.1754944e-38, %v301_v20  ;;  %vm300_vm7 = vcmp.eq.f32.partialorder %v299_v22, 8.507059e+37 }
 0x1a9   : > { %v461_v17 = vpop.eup %460 }
 0x1aa   : > { %v291_v18 = vmul.f32 %v461_v17, %v289_v16  ;;  %vm296_vm3 = vweird.f32 %v461_v17 }
 0x1ab   : > { %vm297_vm5 = vmor %vm295_vm4, %vm296_vm3 }
 0x1ac   : > { %v292_v19 = vsub.f32 1.0, %v291_v18 }
 0x1ae   : > { %v293_v21 = vmul.f32 %v461_v17, %v292_v19 }
 0x1b0   : > { %v294_v23 = vadd.f32 %v461_v17, %v293_v21 }
 0x1b2   : > { %v298_v25 = vsel %vm297_vm5, %v461_v17, %v294_v23 }
 0x1b3   : > { %v303_v26 = vsel %vm300_vm7, %v302_v24, %v298_v25 }
 0x1b4   : > { %306 = vst.msk [vmem:[%s205_s26] sm:$0xf] %vm305_vm6, %v303_v26 }
 0x1b5 PF: > { %s16_s17 = sadd.s32 1, %s542_s17   ;;  %s664_s12 = smov %s526_s13 }
 0x1b6   : > { %p13_p0 = scmp.ge.s32.totalorder %s16_s17, 4   ;;  %s665_s13 = smov %s530_s14 }
 0x1b7   : > { %s666_s14 = smov %s613_s24  ;;  %s667_s15 = smov %s538_s16 }
 0x1b8   : > { %s668_s16 = smov %s670_s19  ;;  %15 = sbr.rel (!%p13_p0) target bundleno = 4 (0x4), region = 83 }
 0x1bd   :  { %326 = vsyncpa [#allocation4], 1 }
 0x1be   :  { %328 = vsyncpa [#allocation4 + $0x1], 1 }

</bundles_post_ra>
